<compile_context>
chip_gen: v6e
topology: v6e:2x2x1
jax: 0.10.0
libtpu: 0.0.40
codegen_flags: <defaults>
</compile_context>

<pallas_src>
import functools

import jax
import jax.numpy as jnp
from jax.experimental import pallas as pl
from jax.experimental.pallas import tpu as pltpu


def _tv_kernel(x_ref, s_ref, out_ref, *, row_shift):
    # x_ref block: (1, b, hw) -> drop the leading block axis.
    x = x_ref[0].astype(jnp.float32)             # (b, hw)
    s_h = s_ref[0:1, :]                          # (1, hw): mask_h * 2*wt/(N*count_h)
    s_w = s_ref[1:2, :]                          # (1, hw): mask_w * 2*wt/(N*count_w)

    # Vertical diff  x[j] - x[j - W]   (valid exactly where s_h != 0)
    dh = x - pltpu.roll(x, shift=row_shift, axis=1)
    # Horizontal diff x[j] - x[j - 1]  (valid exactly where s_w != 0)
    dw = x - pltpu.roll(x, shift=1, axis=1)

    # One fused, pre-scaled partial per grid step: a single cross-lane
    # reduction and a single SMEM scalar writeback (no cross-step RMW chain,
    # so the grid axis stays 'parallel').
    out_ref[0, 0] = jnp.sum(dh * dh * s_h + dw * dw * s_w)


def _vmem_capacity_bytes() -> int:
    """Physical VMEM of the current chip; conservative default if unknown."""
    try:
        cap = getattr(pltpu.get_tpu_info(), "vmem_capacity_bytes", None)
        if cap:
            return int(cap)
    except Exception:
        pass
    return 64 * 1024 * 1024  # v7x-sized conservative default


def _pick_planes_per_block(nc: int, hw: int, target_tile_bytes: int) -> int:
    """Largest divisor of nc whose (b, hw) f32-equivalent block fits the target.

    Using a divisor means the grid never produces a partial block, so neither
    wrapper-side padding nor in-kernel plane-validity masking is needed.  For
    inputs with >= 1 MiB of data we prefer a divisor that yields >= 2 blocks
    so the 'parallel' grid axis can use both TensorCores on v7x.
    """
    planes_fit = max(1, target_tile_bytes // (hw * 4))
    divisors = [d for d in range(1, nc + 1) if nc % d == 0]
    fitting = [d for d in divisors if d <= planes_fit] or [1]
    b = max(fitting)
    if nc * hw * 4 >= (1 << 20):
        multi = [d for d in fitting if d < nc]
        # Only split when per-block work stays big enough to amortize the
        # ~0.35 us per-grid-step overhead.
        if multi and max(multi) * hw * 4 >= (256 << 10):
            b = max(multi)
    return b


def tv_loss(x, tv_loss_weight: float = 1.0):
    """Total-variation loss matching the PyTorch TVLoss.forward exactly.

    x: (N, C, H, W) array. Returns a float32 scalar.
    """
    n, c, h, w = x.shape
    nc = n * c
    hw = h * w
    itemsize = jnp.dtype(x.dtype).itemsize

    # Generation-aware block target / scoped-VMEM budget.
    if _vmem_capacity_bytes() >= 96 * 1024 * 1024:   # v5e / v6e (128 MiB VMEM)
        target_tile_bytes = 8 * 1024 * 1024
        vmem_limit = 96 * 1024 * 1024
    else:                                            # v7x (64 MiB) or unknown
        target_tile_bytes = 4 * 1024 * 1024
        vmem_limit = 48 * 1024 * 1024

    b = _pick_planes_per_block(nc, hw, target_tile_bytes)
    num_blocks = nc // b

    # Free reshape (planes stay contiguous); no pad copies anywhere.
    x3 = x.reshape(num_blocks, b, hw)

    # Same denominators as the PyTorch module; count==0 (H==1 / W==1) folds to
    # inf * 0 = nan in the scale rows, reproducing torch's 0/0 -> nan.
    count_h = c * (h - 1) * w
    count_w = c * h * (w - 1)
    c_h = (2.0 * tv_loss_weight) / (n * count_h) if count_h > 0 else float("inf")
    c_w = (2.0 * tv_loss_weight) / (n * count_w) if count_w > 0 else float("inf")

    # Pre-scaled validity rows (tiny (2, hw) array; fetched once by the kernel
    # since its block index is constant): row 0 -> vertical, row 1 -> horizontal.
    col = jnp.arange(hw, dtype=jnp.int32)
    s_h = (col >= w).astype(jnp.float32) * jnp.float32(c_h)        # (H-1)*W valid
    s_w = ((col % w) != 0).astype(jnp.float32) * jnp.float32(c_w)  # H*(W-1) valid
    scales = jnp.stack([s_h, s_w], axis=0)                         # (2, hw)

    kernel = functools.partial(_tv_kernel, row_shift=w)

    parts = pl.pallas_call(
        kernel,
        out_shape=jax.ShapeDtypeStruct((num_blocks, 1), jnp.float32),
        grid_spec=pltpu.PrefetchScalarGridSpec(
            num_scalar_prefetch=0,
            grid=(num_blocks,),
            in_specs=[
                pl.BlockSpec((1, b, hw), lambda i: (i, 0, 0)),
                pl.BlockSpec((2, hw), lambda i: (0, 0)),
            ],
            out_specs=pl.BlockSpec((1, 1), lambda i: (i, 0),
                                   memory_space=pltpu.SMEM),
        ),
        compiler_params=pltpu.CompilerParams(
            dimension_semantics=("parallel",),
            vmem_limit_bytes=vmem_limit,
        ),
        cost_estimate=pl.CostEstimate(
            flops=8 * nc * hw,
            transcendentals=0,
            bytes_accessed=int(nc * hw * itemsize + 2 * hw * 4 + num_blocks * 4),
        ),
    )(x3, scales)

    # Tiny final reduction over per-block partials; all scaling already folded.
    return jnp.sum(parts)


def tv_loss_ref(x, tv_loss_weight: float = 1.0):
    """Pure-JAX reference (mirrors the PyTorch forward)."""
    n, c, h, w = x.shape
    x = x.astype(jnp.float32)
    count_h = c * (h - 1) * w
    count_w = c * h * (w - 1)
    h_tv = jnp.sum(jnp.square(x[:, :, 1:, :] - x[:, :, : h - 1, :]))
    w_tv = jnp.sum(jnp.square(x[:, :, :, 1:] - x[:, :, :, : w - 1]))
    return tv_loss_weight * 2.0 * (h_tv / count_h + w_tv / count_w) / n


if __name__ == "__main__":
    key = jax.random.PRNGKey(0)
    k1, k2 = jax.random.split(key)

    # Primary shape implied by the module spec.
    x1 = jax.random.normal(k1, (2, 4, 16, 16), dtype=jnp.float32)
    out1 = jax.block_until_ready(tv_loss(x1, tv_loss_weight=1.0))
    ref1 = tv_loss_ref(x1, tv_loss_weight=1.0)
    assert jnp.allclose(out1, ref1, rtol=1e-5, atol=1e-5), (out1, ref1)

    # Non-square planes (H != W), odd plane count and a non-unit weight, to pin
    # the roll semantics and the folded per-direction scales.
    x2 = jax.random.normal(k2, (2, 3, 8, 16), dtype=jnp.float32)
    out2 = jax.block_until_ready(tv_loss(x2, tv_loss_weight=0.5))
    ref2 = tv_loss_ref(x2, tv_loss_weight=0.5)
    assert jnp.allclose(out2, ref2, rtol=1e-5, atol=1e-5), (out2, ref2)

    print("KERNEL_OK")
</pallas_src>

<mosaic_0001>
module attributes {stable_mosaic.version = 11 : i64} {
  func.func @_tv_kernel(%arg0: i32, %arg1: memref<1x8x256xf32, #tpu.memory_space<vmem>>, %arg2: memref<2x256xf32, #tpu.memory_space<vmem>>, %arg3: memref<1x1xf32, #tpu.memory_space<smem>>) attributes {dimension_semantics = [#tpu.dimension_semantics<parallel>], iteration_bounds = array<i64: 1>, scalar_prefetch = 0 : i64, scratch_operands = 0 : i64, tpu.core_type = #tpu.core_type<tc>, window_params = [{transform_indices = @transform_0, window_bounds = array<i64: 1, 8, 256>}, {pipeline_mode = #tpu.pipeline_mode<synchronous>, transform_indices = @transform_1, window_bounds = array<i64: 2, 256>}, {transform_indices = @transform_2, window_bounds = array<i64: 1, 1>}]} {
    %c0 = arith.constant 0 : index
    %c0_0 = arith.constant 0 : index
    %c0_1 = arith.constant 0 : index
    %0 = vector.load %arg1[%c0, %c0_0, %c0_1] : memref<1x8x256xf32, #tpu.memory_space<vmem>>, vector<1x8x256xf32>
    %1 = vector.shape_cast %0 : vector<1x8x256xf32> to vector<8x256xf32>
    %c0_2 = arith.constant 0 : index
    %c0_3 = arith.constant 0 : index
    %2 = vector.load %arg2[%c0_2, %c0_3] : memref<2x256xf32, #tpu.memory_space<vmem>>, vector<1x256xf32>
    %c1 = arith.constant 1 : index
    %c0_4 = arith.constant 0 : index
    %3 = vector.load %arg2[%c1, %c0_4] : memref<2x256xf32, #tpu.memory_space<vmem>>, vector<1x256xf32>
    %c16_i32 = arith.constant 16 : i32
    %4 = tpu.dynamic_rotate %1 by %c16_i32 dim 1 : vector<8x256xf32>, i32 -> vector<8x256xf32>
    %5 = arith.subf %1, %4 : vector<8x256xf32>
    %c1_i32 = arith.constant 1 : i32
    %6 = tpu.dynamic_rotate %1 by %c1_i32 dim 1 : vector<8x256xf32>, i32 -> vector<8x256xf32>
    %7 = arith.subf %1, %6 : vector<8x256xf32>
    %8 = arith.mulf %5, %5 : vector<8x256xf32>
    %9 = vector.broadcast %2 : vector<1x256xf32> to vector<8x256xf32>
    %10 = arith.mulf %8, %9 : vector<8x256xf32>
    %11 = arith.mulf %7, %7 : vector<8x256xf32>
    %12 = vector.broadcast %3 : vector<1x256xf32> to vector<8x256xf32>
    %13 = arith.mulf %11, %12 : vector<8x256xf32>
    %14 = arith.addf %10, %13 : vector<8x256xf32>
    %15 = vector.shape_cast %14 : vector<8x256xf32> to vector<1x8x256xf32>
    %cst = arith.constant dense<0.000000e+00> : vector<1xf32>
    %16 = vector.multi_reduction <add>, %15, %cst [1, 2] : vector<1x8x256xf32> to vector<1xf32>
    %17 = vector.shape_cast %16 : vector<1xf32> to vector<1x1x1xf32>
    %18 = vector.extract %17[0, 0, 0] : f32 from vector<1x1x1xf32>
    %c0_5 = arith.constant 0 : index
    %c0_6 = arith.constant 0 : index
    %19 = memref.load %arg3[%c0_5, %c0_6] : memref<1x1xf32, #tpu.memory_space<smem>>
    memref.store %18, %arg3[%c0_5, %c0_6] : memref<1x1xf32, #tpu.memory_space<smem>>
    return
  }
  func.func @transform_0(%arg0: i32) -> (i32, i32, i32) {
    %c0_i32 = arith.constant 0 : i32
    %c0_i32_0 = arith.constant 0 : i32
    %c0_i32_1 = arith.constant 0 : i32
    return %arg0, %c0_i32, %c0_i32_0 : i32, i32, i32
  }
  func.func @transform_1(%arg0: i32) -> (i32, i32) {
    %c0_i32 = arith.constant 0 : i32
    %c0_i32_0 = arith.constant 0 : i32
    %c0_i32_1 = arith.constant 0 : i32
    return %c0_i32, %c0_i32_0 : i32, i32
  }
  func.func @transform_2(%arg0: i32) -> (i32, i32) {
    %c0_i32 = arith.constant 0 : i32
    %c0_i32_0 = arith.constant 0 : i32
    return %arg0, %c0_i32 : i32, i32
  }
}

</mosaic_0001>

<bundles_post_ra>
// kernel: tpu_custom_call.1
= control target key start
LH: loop header
LB: loop body
LE: loop exit
PB: predicated region body
PF: predicated region fallthrough
CT: control target
= control target key end

     0   :  { %7 = vsyncpa [#allocation3], 0  ;;  %s210_s0 = inlined_call_operand.hbm [shape: f32[1,8,256], index: 0, kind: input, shape index: {}]   ;;  %s211_s1 = inlined_call_operand.hbm [shape: f32[2,256], index: 1, kind: input, shape index: {}]   ;;  %s212_s2 = inlined_call_operand.hbm [shape: f32[1,1], index: 2, kind: output, shape index: {}]  }
   0x1   :  { %8 = vsyncpa [#allocation6], 0 }
   0x2   :  { %9 = vsyncpa [#allocation4], 0  ;;  %s181_s9 = smov [#allocation2]   ;;  %s182_s11 = smov [#allocation5]  }
   0x3   :  { %s16_s10 = sshll.u32 %s181_s9, 4  ;;  %s26_s12 = sshll.u32 %s182_s11, 4  ;;  %s17_s10 = int_to_ptr.vmem [resolvable:$true] %s16_s10  ;;  %s27_s12 = int_to_ptr.vmem [resolvable:$true] %s26_s12 }
   0x4   :  { %s135_s13 = scalar_lea.vmem %s17_s10, 256  ;;  %p140_p1 = scmp.lt.s32.totalorder %s17_s10, %s17_s10 }
   0x5   :  { %p136_p0 = scmp.ne.s32.totalorder %s17_s10, %s135_s13  ;;  %p141_p2 = scmp.lt.s32.totalorder %s135_s13, %s135_s13 }
   0x7   :  { %p142_p3 = por %p141_p2, %p140_p1 }
   0x9   :  { %p143_p4 = pnand %p142_p3, %p136_p0 }
   0xb   :  { %146 = shalt.err (!%p143_p4)
}
   0xc   :  { %19 = dma.hbm_to_vmem [thread:$0]  %s210_s0, 256, %s17_s10, [#allocation3]  }
   0xd   :  { %s155_s16 = scalar_lea.vmem %s27_s12, 64  ;;  %p160_p6 = scmp.lt.s32.totalorder %s27_s12, %s27_s12 }
   0xe   :  { %p156_p5 = scmp.ne.s32.totalorder %s27_s12, %s155_s16  ;;  %p161_p7 = scmp.lt.s32.totalorder %s155_s16, %s155_s16 }
  0x10   :  { %p162_p8 = por %p161_p7, %p160_p6 }
  0x12   :  { %p163_p9 = pnand %p162_p8, %p156_p5 }
  0x14   :  { %166 = shalt.err (!%p163_p9)
}
  0x15   :  { %29 = dma.hbm_to_vmem [thread:$0]  %s211_s1, 64, %s27_s12, [#allocation6]  }
  0x16   :  { %175 = dma.done.wait [#allocation3], 256  }
  0x17   :  { %176 = vsyncadd [#allocation3], 4294967040 }
  0x18   :  { %177 = dma.done.wait [#allocation6], 64  }
  0x19   :  { %178 = vsyncadd [#allocation6], 4294967232  ;;  %v36_v0 = vld [vmem:[#allocation2] sm:$0xff]  ;;  %s183_s19 = smov 1   ;;  %s184_s20 = smov 16   ;;  %v37_v1 = vld [vmem:[#allocation2 + $0x8] sm:$0xff]  ;;  %v45_v2 = vlaneseq }
  0x1a   :  { %52 = vrot.lane.b32.xlu1 %v36_v0, %s183_s19  ;;  %41 = vrot.lane.b32.xlu0 %v36_v0, %s184_s20  ;;  %v40_v9 = vld [vmem:[#allocation5 + $0x1] ss:$2 sm:$0x3]  ;;  %v38_v10 = vld [vmem:[#allocation5] ss:$2 sm:$0x3] }
  0x1b   :  { %v65_v3 = vshrl.u32 %v45_v2, 7  ;;  %v46_v4 = vand.u32 127, %v45_v2  ;;  %s185_s1 = smov [#allocation7]  }
  0x1d   :  { %v66_v7 = vsub.s32 0, %v65_v3  ;;  %v70_v8 = vsub.s32 1, %v65_v3  ;;  %vm56_vm0 = vcmp.lt.s32.totalorder %v46_v4, 1  ;;  %vm47_vm1 = vcmp.lt.s32.totalorder %v46_v4, 16 }
  0x1e   :  { %54 = vrot.lane.b32.xlu1 %v37_v1, %s183_s19  ;;  %43 = vrot.lane.b32.xlu0 %v37_v1, %s184_s20 }
  0x1f   :  { %v82_v11 = vrot.slane %v40_v9, %v66_v7  ;;  %v86_v12 = vrot.slane %v40_v9, %v70_v8  ;;  %v67_v14 = vrot.slane %v38_v10, %v66_v7  ;;  %v71_v15 = vrot.slane %v38_v10, %v70_v8 }
  0x8c   :  { %v53_v5 = vpop.permute.xlu1 %52  ;;  %v42_v6 = vpop.permute.xlu0 %41 }
  0x90   :  { %v55_v13 = vpop.permute.xlu1 %54  ;;  %v44_v16 = vpop.permute.xlu0 %43 }
  0x91   :  { %v57_v17 = vsel %vm56_vm0, %v53_v5, %v55_v13  ;;  %v58_v18 = vsel %vm56_vm0, %v55_v13, %v53_v5  ;;  %v48_v19 = vsel %vm47_vm1, %v42_v6, %v44_v16  ;;  %v49_v20 = vsel %vm47_vm1, %v44_v16, %v42_v6 }
  0x92   :  { %v59_v21 = vsub.f32 %v36_v0, %v58_v18  ;;  %v60_v22 = vsub.f32 %v37_v1, %v57_v17  ;;  %v50_v23 = vsub.f32 %v36_v0, %v49_v20  ;;  %v51_v24 = vsub.f32 %v37_v1, %v48_v19 }
  0x94   :  { %v76_v25 = vmul.f32 %v59_v21, %v59_v21  ;;  %v77_v26 = vmul.f32 %v60_v22, %v60_v22  ;;  %v61_v27 = vmul.f32 %v50_v23, %v50_v23  ;;  %v62_v28 = vmul.f32 %v51_v24, %v51_v24 }
  0x96   :  { %v89_v29 = vmul.f32 %v82_v11, %v76_v25  ;;  %v90_v30 = vmul.f32 %v86_v12, %v77_v26  ;;  %v74_v31 = vmul.f32 %v67_v14, %v61_v27  ;;  %v75_v32 = vmul.f32 %v71_v15, %v62_v28 }
  0x98   :  { %v91_v33 = vadd.f32 %v89_v29, %v74_v31  ;;  %v92_v34 = vadd.f32 %v90_v30, %v75_v32 }
  0x9a   :  { %v93_v35 = vadd.f32 %v92_v34, %v91_v33 }
  0x9c   :  { %94 = vadd.xlane.f32.xlu0 %v93_v35 }
 0x125   :  { %v95_v36 = vpop.xlane.xlu0 %94 }
 0x126   :  { %v96_v37 = vrot.slane %v95_v36, 4 }
 0x128   :  { %v97_v38 = vadd.f32 %v96_v37, %v95_v36 }
 0x12a   :  { %v98_v39 = vrot.slane %v97_v38, 2 }
 0x12c   :  { %v99_v40 = vadd.f32 %v98_v39, %v97_v38 }
 0x12e   :  { %v100_v41 = vrot.slane %v99_v40, 1 }
 0x130   :  { %v101_v42 = vadd.f32 %v100_v41, %v99_v40 }
 0x132   :  { %120 = vpush %v101_v42 }
 0x163   :  { %s121_s0 = spop %120 }
 0x164   :  { %104 = sst [smem:[#allocation7]] %s121_s0 }
 0x165   :  { %112 = dma.smem_to_hbm %s185_s1, 16, %s212_s2, [#allocation4]  }
 0x166   :  { %179 = dma.done.wait [#allocation4], 16  }
 0x167   :  { %180 = vsyncadd [#allocation4], 4294967280 }
 0x168   :  { %116 = sfence }
 0x169   :  { %117 = vsyncpa [#allocation3], 1 }
 0x16a   :  { %118 = vsyncpa [#allocation6], 1 }
 0x16b   :  { %119 = vsyncpa [#allocation4], 1 }

</bundles_post_ra>
